<compile_context>
chip_gen: v6e
topology: v6e:2x2x1
jax: 0.10.0
libtpu: 0.0.40
codegen_flags: <defaults>
</compile_context>

<pallas_src>
import functools

import jax
import jax.numpy as jnp
from jax.experimental import pallas as pl
from jax.experimental.pallas import tpu as pltpu

LANE = 128
SUBLANE = 16  # bf16-friendly sublane multiple (also valid for f32)


def _round_up(x, m):
    return (x + m - 1) // m * m


def make_mlp_kernel(num_layers, compute_dtype):
    """Kernel ref order:
       eu, ei,
       w0_u, w0_i, b0,
       w1, b1, ..., w_{L-1}, b_{L-1},
       wp_row, bp,
       out
    Weights are (in, out), pre-padded to multiples of 128 in both dims and
    stored in compute_dtype. Biases are (1, out_p) f32. wp_row is (1, H_p) f32.
    """

    def kernel(*refs):
        eu_ref, ei_ref = refs[0], refs[1]
        out_ref = refs[-1]

        # Layer 0: concat fused as two matmuls (eu @ W0_u + ei @ W0_i).
        w0u = refs[2][...]
        w0i = refs[3][...]
        b0 = refs[4][...]
        h = (
            jnp.dot(eu_ref[...].astype(compute_dtype), w0u,
                    preferred_element_type=jnp.float32)
            + jnp.dot(ei_ref[...].astype(compute_dtype), w0i,
                      preferred_element_type=jnp.float32)
            + b0
        )
        h = jnp.maximum(h, 0.0)  # ReLU in f32

        idx = 5
        for _ in range(1, num_layers):
            w = refs[idx][...]
            b = refs[idx + 1][...]
            idx += 2
            h = jnp.dot(h.astype(compute_dtype), w,
                        preferred_element_type=jnp.float32) + b
            h = jnp.maximum(h, 0.0)

        # Predict layer (out_features=1): VPU multiply + lane reduce instead of
        # an MXU matmul that would use 1/128 of the lanes.
        wp = refs[idx][...]        # (1, H_p) f32, zero-padded
        bp = refs[idx + 1][...]    # (1, 1)   f32
        out_ref[...] = jnp.sum(h * wp, axis=-1, keepdims=True) + bp

    return kernel


def mlp_predict(eu, ei, layer_ws, layer_bs, w_pred, b_pred, *,
                block_b=512, compute_dtype=jnp.float32):
    """Run the MLP stack + predict layer inside one batch-tiled Pallas kernel.

    eu, ei: (B, F) float embeddings (user / item).
    layer_ws[i]: (in_i, out_i), layer_bs[i]: (out_i,)
    w_pred: (num_factor, 1), b_pred: (1,)
    returns: (B,) float32
    """
    B, F = eu.shape
    num_layers = len(layer_ws)
    Fp = _round_up(F, LANE)

    # Batch tile: one small tile for tiny B, otherwise block_b-row tiles.
    tb = min(block_b, _round_up(B, SUBLANE))
    Bp = _round_up(B, tb)

    def pad2(x, rows, cols):
        return jnp.pad(x, ((0, rows - x.shape[0]), (0, cols - x.shape[1])))

    eu_p = pad2(eu.astype(compute_dtype), Bp, Fp)
    ei_p = pad2(ei.astype(compute_dtype), Bp, Fp)

    # Split W0 so the concat is fused into two matmuls; pad everything lane-dense.
    w0 = layer_ws[0]
    h0p = _round_up(w0.shape[1], LANE)
    w0_u = pad2(w0[:F].astype(compute_dtype), Fp, h0p)
    w0_i = pad2(w0[F:].astype(compute_dtype), Fp, h0p)
    b0 = pad2(layer_bs[0].reshape(1, -1).astype(jnp.float32), 1, h0p)

    act_spec = pl.BlockSpec((tb, Fp), lambda i: (i, 0))
    args = [eu_p, ei_p, w0_u, w0_i, b0]
    in_specs = [
        act_spec,
        act_spec,
        pl.BlockSpec(w0_u.shape, lambda i: (0, 0)),
        pl.BlockSpec(w0_i.shape, lambda i: (0, 0)),
        pl.BlockSpec(b0.shape, lambda i: (0, 0)),
    ]

    for w, b in zip(layer_ws[1:], layer_bs[1:]):
        inp = _round_up(w.shape[0], LANE)
        outp = _round_up(w.shape[1], LANE)
        w_p = pad2(w.astype(compute_dtype), inp, outp)
        b_p = pad2(b.reshape(1, -1).astype(jnp.float32), 1, outp)
        args += [w_p, b_p]
        in_specs += [pl.BlockSpec(w_p.shape, lambda i: (0, 0)),
                     pl.BlockSpec(b_p.shape, lambda i: (0, 0))]

    # Predict layer as a lane-dense f32 row (used by the VPU reduce in-kernel).
    h_last = layer_ws[-1].shape[1]
    wp_row = pad2(w_pred.reshape(1, -1).astype(jnp.float32), 1,
                  _round_up(h_last, LANE))
    bp_s = b_pred.reshape(1, 1).astype(jnp.float32)
    args += [wp_row, bp_s]
    in_specs += [pl.BlockSpec(wp_row.shape, lambda i: (0, 0)),
                 pl.BlockSpec(bp_s.shape, lambda i: (0, 0))]

    out = pl.pallas_call(
        make_mlp_kernel(num_layers, compute_dtype),
        out_shape=jax.ShapeDtypeStruct((Bp, 1), jnp.float32),
        grid=(pl.cdiv(Bp, tb),),
        in_specs=in_specs,
        out_specs=pl.BlockSpec((tb, 1), lambda i: (i, 0)),
        compiler_params=pltpu.CompilerParams(
            dimension_semantics=("parallel",)),
    )(*args)
    return out[:B, 0]


def init_params(key, num_user, num_item, num_factor, num_layer_mlp):
    """Deterministic parameter init matching the PyTorch module's shapes."""
    keys = jax.random.split(key, 3 + 2 * num_layer_mlp)
    # Embeddings: N(0, 0.01)
    embed_user = 0.01 * jax.random.normal(keys[0], (num_user, num_factor), jnp.float32)
    embed_item = 0.01 * jax.random.normal(keys[1], (num_item, num_factor), jnp.float32)

    layer_ws, layer_bs = [], []
    for i in range(num_layer_mlp):
        input_size = num_factor * 2 ** (num_layer_mlp - i)
        in_f = num_factor * 2 if i == 0 else input_size
        out_f = input_size // 2
        # Xavier-uniform-ish init (exact RNG match with torch not required).
        limit = jnp.sqrt(6.0 / (in_f + out_f))
        w = jax.random.uniform(keys[2 + i], (in_f, out_f), jnp.float32, -limit, limit)
        layer_ws.append(w)
        layer_bs.append(jnp.zeros((out_f,), jnp.float32))

    # predict layer: (num_factor -> 1), kaiming-uniform-ish
    limit = jnp.sqrt(3.0 / num_factor)
    w_pred = jax.random.uniform(keys[-1], (num_factor, 1), jnp.float32, -limit, limit)
    b_pred = jnp.zeros((1,), jnp.float32)
    return embed_user, embed_item, layer_ws, layer_bs, w_pred, b_pred


@functools.partial(jax.jit, static_argnames=("block_b", "compute_dtype"))
def mlp_forward(user, item, params, *, block_b=512, compute_dtype=jnp.float32):
    embed_user, embed_item, layer_ws, layer_bs, w_pred, b_pred = params
    # Embedding lookups (plain-JAX glue); concat is fused into the kernel.
    eu = embed_user[user]  # (B, F)
    ei = embed_item[item]  # (B, F)
    return mlp_predict(eu, ei, layer_ws, layer_bs, w_pred, b_pred,
                       block_b=block_b, compute_dtype=compute_dtype)


if __name__ == "__main__":
    num_user, num_item = 16, 32
    num_factor = 8
    num_layer_mlp = 3

    key = jax.random.PRNGKey(0)
    pkey, ukey, ikey = jax.random.split(key, 3)
    params = init_params(pkey, num_user, num_item, num_factor, num_layer_mlp)

    def reference(user, item):
        eu = params[0][user]
        ei = params[1][item]
        h = jnp.concatenate([eu, ei], axis=-1)
        for w, b in zip(params[2], params[3]):
            h = jnp.maximum(h @ w + b, 0.0)
        return (h @ params[4] + params[5]).reshape(-1)

    # 1) Small batch, f32 (single grid step).
    batch = 8
    user = jax.random.randint(ukey, (batch,), 0, num_user, dtype=jnp.int32)
    item = jax.random.randint(ikey, (batch,), 0, num_item, dtype=jnp.int32)
    pred = jax.block_until_ready(mlp_forward(user, item, params))
    assert pred.shape == (batch,)
    assert jnp.allclose(pred, reference(user, item), atol=1e-5, rtol=1e-5)

    # 2) Larger, non-tile-multiple batch, f32 (exercises grid + batch padding).
    batch2 = 200
    u2 = jax.random.randint(jax.random.PRNGKey(1), (batch2,), 0, num_user, dtype=jnp.int32)
    i2 = jax.random.randint(jax.random.PRNGKey(2), (batch2,), 0, num_item, dtype=jnp.int32)
    pred2 = jax.block_until_ready(mlp_forward(u2, i2, params, block_b=64))
    assert pred2.shape == (batch2,)
    assert jnp.allclose(pred2, reference(u2, i2), atol=1e-5, rtol=1e-5)

    # 3) bf16 matmul operands (v6e/v7x bandwidth path); f32 accumulate/elementwise.
    pred3 = jax.block_until_ready(
        mlp_forward(user, item, params, compute_dtype=jnp.bfloat16))
    assert jnp.allclose(pred3, reference(user, item), atol=2e-3, rtol=5e-2)

    print("KERNEL_OK")
</pallas_src>

<mosaic_0001>
module attributes {stable_mosaic.version = 11 : i64} {
  func.func @kernel(%arg0: i32, %arg1: memref<16x128xf32, #tpu.memory_space<vmem>>, %arg2: memref<16x128xf32, #tpu.memory_space<vmem>>, %arg3: memref<128x128xf32, #tpu.memory_space<vmem>>, %arg4: memref<128x128xf32, #tpu.memory_space<vmem>>, %arg5: memref<1x128xf32, #tpu.memory_space<vmem>>, %arg6: memref<128x128xf32, #tpu.memory_space<vmem>>, %arg7: memref<1x128xf32, #tpu.memory_space<vmem>>, %arg8: memref<128x128xf32, #tpu.memory_space<vmem>>, %arg9: memref<1x128xf32, #tpu.memory_space<vmem>>, %arg10: memref<1x128xf32, #tpu.memory_space<vmem>>, %arg11: memref<1x1xf32, #tpu.memory_space<vmem>>, %arg12: memref<16x1xf32, #tpu.memory_space<vmem>>) attributes {dimension_semantics = [#tpu.dimension_semantics<parallel>], iteration_bounds = array<i64: 1>, scalar_prefetch = 0 : i64, scratch_operands = 0 : i64, tpu.core_type = #tpu.core_type<tc>, window_params = [{transform_indices = @transform_0, window_bounds = array<i64: 16, 128>}, {transform_indices = @transform_1, window_bounds = array<i64: 16, 128>}, {pipeline_mode = #tpu.pipeline_mode<synchronous>, transform_indices = @transform_2, window_bounds = array<i64: 128, 128>}, {pipeline_mode = #tpu.pipeline_mode<synchronous>, transform_indices = @transform_3, window_bounds = array<i64: 128, 128>}, {pipeline_mode = #tpu.pipeline_mode<synchronous>, transform_indices = @transform_4, window_bounds = array<i64: 1, 128>}, {pipeline_mode = #tpu.pipeline_mode<synchronous>, transform_indices = @transform_5, window_bounds = array<i64: 128, 128>}, {pipeline_mode = #tpu.pipeline_mode<synchronous>, transform_indices = @transform_6, window_bounds = array<i64: 1, 128>}, {pipeline_mode = #tpu.pipeline_mode<synchronous>, transform_indices = @transform_7, window_bounds = array<i64: 128, 128>}, {pipeline_mode = #tpu.pipeline_mode<synchronous>, transform_indices = @transform_8, window_bounds = array<i64: 1, 128>}, {pipeline_mode = #tpu.pipeline_mode<synchronous>, transform_indices = @transform_9, window_bounds = array<i64: 1, 128>}, {pipeline_mode = #tpu.pipeline_mode<synchronous>, transform_indices = @transform_10, window_bounds = array<i64: 1, 1>}, {transform_indices = @transform_11, window_bounds = array<i64: 16, 1>}]} {
    %c0 = arith.constant 0 : index
    %c0_0 = arith.constant 0 : index
    %0 = vector.load %arg3[%c0, %c0_0] : memref<128x128xf32, #tpu.memory_space<vmem>>, vector<128x128xf32>
    %c0_1 = arith.constant 0 : index
    %c0_2 = arith.constant 0 : index
    %1 = vector.load %arg4[%c0_1, %c0_2] : memref<128x128xf32, #tpu.memory_space<vmem>>, vector<128x128xf32>
    %c0_3 = arith.constant 0 : index
    %c0_4 = arith.constant 0 : index
    %2 = vector.load %arg5[%c0_3, %c0_4] : memref<1x128xf32, #tpu.memory_space<vmem>>, vector<1x128xf32>
    %c0_5 = arith.constant 0 : index
    %c0_6 = arith.constant 0 : index
    %3 = vector.load %arg1[%c0_5, %c0_6] : memref<16x128xf32, #tpu.memory_space<vmem>>, vector<16x128xf32>
    %cst = arith.constant dense<0.000000e+00> : vector<16x128xf32>
    %4 = tpu.matmul %3, %0, %cst {dimension_numbers = #tpu.dot_dimension_numbers<[1], [0], [0], [1], [0, 0, 1, 1], [], []>} : vector<16x128xf32>, vector<128x128xf32>, vector<16x128xf32> -> vector<16x128xf32>
    %c0_7 = arith.constant 0 : index
    %c0_8 = arith.constant 0 : index
    %5 = vector.load %arg2[%c0_7, %c0_8] : memref<16x128xf32, #tpu.memory_space<vmem>>, vector<16x128xf32>
    %cst_9 = arith.constant dense<0.000000e+00> : vector<16x128xf32>
    %6 = tpu.matmul %5, %1, %cst_9 {dimension_numbers = #tpu.dot_dimension_numbers<[1], [0], [0], [1], [0, 0, 1, 1], [], []>} : vector<16x128xf32>, vector<128x128xf32>, vector<16x128xf32> -> vector<16x128xf32>
    %7 = arith.addf %4, %6 : vector<16x128xf32>
    %8 = vector.broadcast %2 : vector<1x128xf32> to vector<16x128xf32>
    %9 = arith.addf %7, %8 : vector<16x128xf32>
    %cst_10 = arith.constant 0.000000e+00 : f32
    %10 = vector.broadcast %cst_10 : f32 to vector<16x128xf32>
    %11 = arith.maximumf %9, %10 : vector<16x128xf32>
    %c0_11 = arith.constant 0 : index
    %c0_12 = arith.constant 0 : index
    %12 = vector.load %arg6[%c0_11, %c0_12] : memref<128x128xf32, #tpu.memory_space<vmem>>, vector<128x128xf32>
    %c0_13 = arith.constant 0 : index
    %c0_14 = arith.constant 0 : index
    %13 = vector.load %arg7[%c0_13, %c0_14] : memref<1x128xf32, #tpu.memory_space<vmem>>, vector<1x128xf32>
    %cst_15 = arith.constant dense<0.000000e+00> : vector<16x128xf32>
    %14 = tpu.matmul %11, %12, %cst_15 {dimension_numbers = #tpu.dot_dimension_numbers<[1], [0], [0], [1], [0, 0, 1, 1], [], []>} : vector<16x128xf32>, vector<128x128xf32>, vector<16x128xf32> -> vector<16x128xf32>
    %15 = vector.broadcast %13 : vector<1x128xf32> to vector<16x128xf32>
    %16 = arith.addf %14, %15 : vector<16x128xf32>
    %cst_16 = arith.constant 0.000000e+00 : f32
    %17 = vector.broadcast %cst_16 : f32 to vector<16x128xf32>
    %18 = arith.maximumf %16, %17 : vector<16x128xf32>
    %c0_17 = arith.constant 0 : index
    %c0_18 = arith.constant 0 : index
    %19 = vector.load %arg8[%c0_17, %c0_18] : memref<128x128xf32, #tpu.memory_space<vmem>>, vector<128x128xf32>
    %c0_19 = arith.constant 0 : index
    %c0_20 = arith.constant 0 : index
    %20 = vector.load %arg9[%c0_19, %c0_20] : memref<1x128xf32, #tpu.memory_space<vmem>>, vector<1x128xf32>
    %cst_21 = arith.constant dense<0.000000e+00> : vector<16x128xf32>
    %21 = tpu.matmul %18, %19, %cst_21 {dimension_numbers = #tpu.dot_dimension_numbers<[1], [0], [0], [1], [0, 0, 1, 1], [], []>} : vector<16x128xf32>, vector<128x128xf32>, vector<16x128xf32> -> vector<16x128xf32>
    %22 = vector.broadcast %20 : vector<1x128xf32> to vector<16x128xf32>
    %23 = arith.addf %21, %22 : vector<16x128xf32>
    %cst_22 = arith.constant 0.000000e+00 : f32
    %24 = vector.broadcast %cst_22 : f32 to vector<16x128xf32>
    %25 = arith.maximumf %23, %24 : vector<16x128xf32>
    %c0_23 = arith.constant 0 : index
    %c0_24 = arith.constant 0 : index
    %26 = vector.load %arg10[%c0_23, %c0_24] : memref<1x128xf32, #tpu.memory_space<vmem>>, vector<1x128xf32>
    %c0_25 = arith.constant 0 : index
    %c0_26 = arith.constant 0 : index
    %27 = vector.load %arg11[%c0_25, %c0_26] : memref<1x1xf32, #tpu.memory_space<vmem>>, vector<1x1xf32>
    %28 = vector.broadcast %26 : vector<1x128xf32> to vector<16x128xf32>
    %29 = arith.mulf %25, %28 : vector<16x128xf32>
    %cst_27 = arith.constant dense<0.000000e+00> : vector<16xf32>
    %30 = vector.multi_reduction <add>, %29, %cst_27 [1] : vector<16x128xf32> to vector<16xf32>
    %31 = vector.shape_cast %30 : vector<16xf32> to vector<16x1xf32>
    %32 = vector.broadcast %27 : vector<1x1xf32> to vector<16x1xf32>
    %33 = arith.addf %31, %32 : vector<16x1xf32>
    %c0_28 = arith.constant 0 : index
    %c0_29 = arith.constant 0 : index
    %34 = vector.load %arg12[%c0_28, %c0_29] : memref<16x1xf32, #tpu.memory_space<vmem>>, vector<16x1xf32>
    tpu.vector_store %arg12[%c0_28, %c0_29], %33 {strides = array<i32>} : memref<16x1xf32, #tpu.memory_space<vmem>>, vector<16x1xf32>,
    return
  }
  func.func @transform_0(%arg0: i32) -> (i32, i32) {
    %c0_i32 = arith.constant 0 : i32
    %c0_i32_0 = arith.constant 0 : i32
    return %arg0, %c0_i32 : i32, i32
  }
  func.func @transform_1(%arg0: i32) -> (i32, i32) {
    %c0_i32 = arith.constant 0 : i32
    %c0_i32_0 = arith.constant 0 : i32
    return %arg0, %c0_i32 : i32, i32
  }
  func.func @transform_2(%arg0: i32) -> (i32, i32) {
    %c0_i32 = arith.constant 0 : i32
    %c0_i32_0 = arith.constant 0 : i32
    %c0_i32_1 = arith.constant 0 : i32
    return %c0_i32, %c0_i32_0 : i32, i32
  }
  func.func @transform_3(%arg0: i32) -> (i32, i32) {
    %c0_i32 = arith.constant 0 : i32
    %c0_i32_0 = arith.constant 0 : i32
    %c0_i32_1 = arith.constant 0 : i32
    return %c0_i32, %c0_i32_0 : i32, i32
  }
  func.func @transform_4(%arg0: i32) -> (i32, i32) {
    %c0_i32 = arith.constant 0 : i32
    %c0_i32_0 = arith.constant 0 : i32
    %c0_i32_1 = arith.constant 0 : i32
    return %c0_i32, %c0_i32_0 : i32, i32
  }
  func.func @transform_5(%arg0: i32) -> (i32, i32) {
    %c0_i32 = arith.constant 0 : i32
    %c0_i32_0 = arith.constant 0 : i32
    %c0_i32_1 = arith.constant 0 : i32
    return %c0_i32, %c0_i32_0 : i32, i32
  }
  func.func @transform_6(%arg0: i32) -> (i32, i32) {
    %c0_i32 = arith.constant 0 : i32
    %c0_i32_0 = arith.constant 0 : i32
    %c0_i32_1 = arith.constant 0 : i32
    return %c0_i32, %c0_i32_0 : i32, i32
  }
  func.func @transform_7(%arg0: i32) -> (i32, i32) {
    %c0_i32 = arith.constant 0 : i32
    %c0_i32_0 = arith.constant 0 : i32
    %c0_i32_1 = arith.constant 0 : i32
    return %c0_i32, %c0_i32_0 : i32, i32
  }
  func.func @transform_8(%arg0: i32) -> (i32, i32) {
    %c0_i32 = arith.constant 0 : i32
    %c0_i32_0 = arith.constant 0 : i32
    %c0_i32_1 = arith.constant 0 : i32
    return %c0_i32, %c0_i32_0 : i32, i32
  }
  func.func @transform_9(%arg0: i32) -> (i32, i32) {
    %c0_i32 = arith.constant 0 : i32
    %c0_i32_0 = arith.constant 0 : i32
    %c0_i32_1 = arith.constant 0 : i32
    return %c0_i32, %c0_i32_0 : i32, i32
  }
  func.func @transform_10(%arg0: i32) -> (i32, i32) {
    %c0_i32 = arith.constant 0 : i32
    %c0_i32_0 = arith.constant 0 : i32
    %c0_i32_1 = arith.constant 0 : i32
    return %c0_i32, %c0_i32_0 : i32, i32
  }
  func.func @transform_11(%arg0: i32) -> (i32, i32) {
    %c0_i32 = arith.constant 0 : i32
    %c0_i32_0 = arith.constant 0 : i32
    return %arg0, %c0_i32 : i32, i32
  }
}

</mosaic_0001>

<bundles_post_ra>
// kernel: mlp_forward.1
= control target key start
LH: loop header
LB: loop body
LE: loop exit
PB: predicated region body
PF: predicated region fallthrough
CT: control target
= control target key end

     0   :  { %vm459_vm0 = vcmask 7168   ;;  %s968_s3 = inlined_call_operand.vmem [shape: f32[128,128], index: 3, kind: input, shape index: {}]   ;;  %s969_s2 = inlined_call_operand.vmem [shape: f32[128,128], index: 2, kind: input, shape index: {}]   ;;  %s970_s1 = inlined_call_operand.vmem [shape: f32[16,128], index: 1, kind: input, shape index: {}]   ;;  %s971_s0 = inlined_call_operand.vmem [shape: f32[16,128], index: 0, kind: input, shape index: {}]   ;;  %s972_s5 = inlined_call_operand.vmem [shape: f32[128,128], index: 5, kind: input, shape index: {}]   ;;  %s973_s7 = inlined_call_operand.vmem [shape: f32[128,128], index: 7, kind: input, shape index: {}]   ;;  %s974_s4 = inlined_call_operand.vmem [shape: f32[1,128], index: 4, kind: input, shape index: {}]   ;;  %s975_s6 = inlined_call_operand.vmem [shape: f32[1,128], index: 6, kind: input, shape index: {}]   ;;  %s976_s10 = inlined_call_operand.<no memory space> [shape: f32[1,1], index: 10, kind: input, shape index: {}]   ;;  %s977_s8 = inlined_call_operand.vmem [shape: f32[1,128], index: 8, kind: input, shape index: {}]   ;;  %s978_s9 = inlined_call_operand.vmem [shape: f32[1,128], index: 9, kind: input, shape index: {}]   ;;  %s979_s11 = inlined_call_operand.vmem [shape: f32[16,1], index: 11, kind: output, shape index: {}]  }
   0x1   :  { %v71_v0 = vld [vmem:[%s968_s3 + $0x78] sm:$0xff]  ;;  %v70_v2 = vld [vmem:[%s968_s3 + $0x70] sm:$0xff]  ;;  %v69_v4 = vld [vmem:[%s968_s3 + $0x68] sm:$0xff] }
   0x2   :  { %v55_v1 = vld [vmem:[%s969_s2 + $0x78] sm:$0xff]  ;;  %543 = vmatprep.subr.mxu0 %v71_v0  ;;  %v54_v3 = vld [vmem:[%s969_s2 + $0x70] sm:$0xff]  ;;  %v53_v5 = vld [vmem:[%s969_s2 + $0x68] sm:$0xff] }
   0x3   :  { %578 = vmatprep.subr.mxu1 %v55_v1  ;;  %544 = vmatpush3.msra.mxu0 %v71_v0  ;;  %v68_v6 = vld [vmem:[%s968_s3 + $0x60] sm:$0xff]  ;;  %v67_v8 = vld [vmem:[%s968_s3 + $0x58] sm:$0xff]  ;;  %v66_v10 = vld [vmem:[%s968_s3 + $0x50] sm:$0xff] }
   0x4   :  { %579 = vmatpush3.msra.mxu1 %v55_v1  ;;  %545 = vmatprep.subr.mxu0 %v70_v2  ;;  %v52_v7 = vld [vmem:[%s969_s2 + $0x60] sm:$0xff]  ;;  %v51_v9 = vld [vmem:[%s969_s2 + $0x58] sm:$0xff]  ;;  %v50_v11 = vld [vmem:[%s969_s2 + $0x50] sm:$0xff] }
   0x5   :  { %580 = vmatprep.subr.mxu1 %v54_v3  ;;  %546 = vmatpush3.msra.mxu0 %v70_v2  ;;  %v65_v12 = vld [vmem:[%s968_s3 + $0x48] sm:$0xff]  ;;  %v64_v14 = vld [vmem:[%s968_s3 + $0x40] sm:$0xff]  ;;  %v63_v16 = vld [vmem:[%s968_s3 + $0x38] sm:$0xff] }
   0x6   :  { %581 = vmatpush3.msra.mxu1 %v54_v3  ;;  %547 = vmatprep.subr.mxu0 %v69_v4  ;;  %v49_v13 = vld [vmem:[%s969_s2 + $0x48] sm:$0xff]  ;;  %v48_v15 = vld [vmem:[%s969_s2 + $0x40] sm:$0xff]  ;;  %v47_v17 = vld [vmem:[%s969_s2 + $0x38] sm:$0xff] }
   0x7   :  { %582 = vmatprep.subr.mxu1 %v53_v5  ;;  %548 = vmatpush3.msra.mxu0 %v69_v4  ;;  %v62_v18 = vld [vmem:[%s968_s3 + $0x30] sm:$0xff]  ;;  %v61_v20 = vld [vmem:[%s968_s3 + $0x28] sm:$0xff]  ;;  %v60_v22 = vld [vmem:[%s968_s3 + $0x20] sm:$0xff] }
   0x8   :  { %583 = vmatpush3.msra.mxu1 %v53_v5  ;;  %549 = vmatprep.subr.mxu0 %v68_v6  ;;  %v46_v19 = vld [vmem:[%s969_s2 + $0x30] sm:$0xff]  ;;  %v45_v21 = vld [vmem:[%s969_s2 + $0x28] sm:$0xff]  ;;  %v44_v23 = vld [vmem:[%s969_s2 + $0x20] sm:$0xff] }
   0x9   :  { %584 = vmatprep.subr.mxu1 %v52_v7  ;;  %550 = vmatpush3.msra.mxu0 %v68_v6  ;;  %v59_v24 = vld [vmem:[%s968_s3 + $0x18] sm:$0xff]  ;;  %v58_v26 = vld [vmem:[%s968_s3 + $0x10] sm:$0xff]  ;;  %v57_v28 = vld [vmem:[%s968_s3 + $0x8] sm:$0xff] }
   0xa   :  { %585 = vmatpush3.msra.mxu1 %v52_v7  ;;  %551 = vmatprep.subr.mxu0 %v67_v8  ;;  %v43_v25 = vld [vmem:[%s969_s2 + $0x18] sm:$0xff]  ;;  %v42_v27 = vld [vmem:[%s969_s2 + $0x10] sm:$0xff]  ;;  %v41_v29 = vld [vmem:[%s969_s2 + $0x8] sm:$0xff] }
   0xb   :  { %586 = vmatprep.subr.mxu1 %v51_v9  ;;  %552 = vmatpush3.msra.mxu0 %v67_v8  ;;  %v56_v30 = vld [vmem:[%s968_s3] sm:$0xff]  ;;  %v76_v34 = vld [vmem:[%s970_s1 + $0x8] sm:$0xff]  ;;  %v252_v36 = vld [vmem:[%s972_s5 + $0x78] sm:$0xff] }
   0xc   :  { %587 = vmatpush3.msra.mxu1 %v51_v9  ;;  %553 = vmatprep.subr.mxu0 %v66_v10  ;;  %v40_v31 = vld [vmem:[%s969_s2] sm:$0xff]  ;;  %v74_v35 = vld [vmem:[%s971_s0 + $0x8] sm:$0xff]  ;;  %v251_v37 = vld [vmem:[%s972_s5 + $0x70] sm:$0xff] }
   0xd   :  { %588 = vmatprep.subr.mxu1 %v50_v11  ;;  %554 = vmatpush3.msra.mxu0 %v66_v10  ;;  %v75_v32 = vld [vmem:[%s970_s1] sm:$0xff]  ;;  %v250_v38 = vld [vmem:[%s972_s5 + $0x68] sm:$0xff]  ;;  %v248_v40 = vld [vmem:[%s972_s5 + $0x58] sm:$0xff] }
   0xe   :  { %589 = vmatpush3.msra.mxu1 %v50_v11  ;;  %555 = vmatprep.subr.mxu0 %v65_v12  ;;  %v73_v33 = vld [vmem:[%s971_s0] sm:$0xff]  ;;  %v247_v41 = vld [vmem:[%s972_s5 + $0x50] sm:$0xff]  ;;  %v246_v42 = vld [vmem:[%s972_s5 + $0x48] sm:$0xff] }
   0xf   :  { %590 = vmatprep.subr.mxu1 %v49_v13  ;;  %556 = vmatpush3.msra.mxu0 %v65_v12  ;;  %v249_v39 = vld [vmem:[%s972_s5 + $0x60] sm:$0xff]  ;;  %v244_v44 = vld [vmem:[%s972_s5 + $0x38] sm:$0xff]  ;;  %v243_v45 = vld [vmem:[%s972_s5 + $0x30] sm:$0xff] }
  0x10   :  { %591 = vmatpush3.msra.mxu1 %v49_v13  ;;  %557 = vmatprep.subr.mxu0 %v64_v14  ;;  %v245_v43 = vld [vmem:[%s972_s5 + $0x40] sm:$0xff]  ;;  %v242_v46 = vld [vmem:[%s972_s5 + $0x28] sm:$0xff]  ;;  %v240_v48 = vld [vmem:[%s972_s5 + $0x18] sm:$0xff] }
  0x11   :  { %592 = vmatprep.subr.mxu1 %v48_v15  ;;  %558 = vmatpush3.msra.mxu0 %v64_v14  ;;  %v241_v47 = vld [vmem:[%s972_s5 + $0x20] sm:$0xff]  ;;  %v239_v49 = vld [vmem:[%s972_s5 + $0x10] sm:$0xff]  ;;  %v238_v50 = vld [vmem:[%s972_s5 + $0x8] sm:$0xff] }
  0x12   :  { %593 = vmatpush3.msra.mxu1 %v48_v15  ;;  %559 = vmatprep.subr.mxu0 %v63_v16  ;;  %v237_v51 = vld [vmem:[%s972_s5] sm:$0xff]  ;;  %v352_v52 = vld [vmem:[%s973_s7 + $0x78] sm:$0xff]  ;;  %v351_v53 = vld [vmem:[%s973_s7 + $0x70] sm:$0xff] }
  0x13   :  { %594 = vmatprep.subr.mxu1 %v47_v17  ;;  %560 = vmatpush3.msra.mxu0 %v63_v16  ;;  %v350_v54 = vld [vmem:[%s973_s7 + $0x68] sm:$0xff]  ;;  %v349_v55 = vld [vmem:[%s973_s7 + $0x60] sm:$0xff]  ;;  %v348_v56 = vld [vmem:[%s973_s7 + $0x58] sm:$0xff] }
  0x14   :  { %595 = vmatpush3.msra.mxu1 %v47_v17  ;;  %561 = vmatprep.subr.mxu0 %v62_v18  ;;  %v347_v57 = vld [vmem:[%s973_s7 + $0x50] sm:$0xff]  ;;  %v346_v58 = vld [vmem:[%s973_s7 + $0x48] sm:$0xff]  ;;  %v345_v59 = vld [vmem:[%s973_s7 + $0x40] sm:$0xff] }
  0x15   :  { %596 = vmatprep.subr.mxu1 %v46_v19  ;;  %562 = vmatpush3.msra.mxu0 %v62_v18  ;;  %v344_v60 = vld [vmem:[%s973_s7 + $0x38] sm:$0xff]  ;;  %v343_v61 = vld [vmem:[%s973_s7 + $0x30] sm:$0xff]  ;;  %v342_v62 = vld [vmem:[%s973_s7 + $0x28] sm:$0xff] }
  0x16   :  { %597 = vmatpush3.msra.mxu1 %v46_v19  ;;  %563 = vmatprep.subr.mxu0 %v61_v20  ;;  %v341_v63 = vld [vmem:[%s973_s7 + $0x20] sm:$0xff]  ;;  %v340_v11 = vld [vmem:[%s973_s7 + $0x18] sm:$0xff]  ;;  %v339_v12 = vld [vmem:[%s973_s7 + $0x10] sm:$0xff] }
  0x17   :  { %598 = vmatprep.subr.mxu1 %v45_v21  ;;  %564 = vmatpush3.msra.mxu0 %v61_v20  ;;  %v466_v2 = vld [vmem:[%s974_s4] ss:$0 sm:$0xff]  ;;  %v338_v13 = vld [vmem:[%s973_s7 + $0x8] sm:$0xff] }
  0x18   :  { %599 = vmatpush3.msra.mxu1 %v45_v21  ;;  %565 = vmatprep.subr.mxu0 %v60_v22  ;;  %v337_v14 = vld [vmem:[%s973_s7] sm:$0xff] }
  0x19   :  { %600 = vmatprep.subr.mxu1 %v44_v23  ;;  %566 = vmatpush3.msra.mxu0 %v60_v22  ;;  %v467_v15 = vld [vmem:[%s975_s6] ss:$0 sm:$0xff]  ;;  %v16_v22 = vstv %s976_s10 }
  0x1a   :  { %601 = vmatpush3.msra.mxu1 %v44_v23  ;;  %567 = vmatprep.subr.mxu0 %v59_v24  ;;  %17 = vst [vmem:[#allocation2] sm:$0x1] %v16_v22 }
  0x1b   :  { %602 = vmatprep.subr.mxu1 %v43_v25  ;;  %568 = vmatpush3.msra.mxu0 %v59_v24  ;;  %v468_v24 = vld [vmem:[%s977_s8] ss:$0 sm:$0xff] }
  0x1c   :  { %603 = vmatpush3.msra.mxu1 %v43_v25  ;;  %569 = vmatprep.subr.mxu0 %v58_v26 }
  0x1d   :  { %604 = vmatprep.subr.mxu1 %v42_v27  ;;  %570 = vmatpush3.msra.mxu0 %v58_v26 }
  0x1e   :  { %605 = vmatpush3.msra.mxu1 %v42_v27  ;;  %571 = vmatprep.subr.mxu0 %v57_v28 }
  0x1f   :  { %606 = vmatprep.subr.mxu1 %v41_v29  ;;  %572 = vmatpush3.msra.mxu0 %v57_v28 }
  0x20   :  { %607 = vmatpush3.msra.mxu1 %v41_v29  ;;  %573 = vmatprep.subr.mxu0 %v56_v30  ;;  %v469_v29 = vld [vmem:[%s978_s9] ss:$0 sm:$0xff] }
  0x21   :  { %608 = vmatprep.subr.mxu1 %v40_v31  ;;  %574 = vmatpush3.msra.mxu0 %v56_v30 }
  0x22   :  { %575 = vmatprep.mubr.f32.mxu0 %v75_v32  ;;  %609 = vmatpush3.msra.mxu1 %v40_v31 }
  0x23   :  { %610 = vmatprep.mubr.f32.mxu1 %v73_v33  ;;  %576 = vmatmul.mubr.f32.vlgmr.msra.gmra.mxu0 %v76_v34  ;;  %v470_v33 = vld [vmem:[#allocation2] ss:$0 sm:$0xff] }
  0x24   :  { %611 = vmatmul.mubr.f32.vlgmr.msra.gmra.mxu1 %v74_v35  ;;  %613 = vmatprep.subr.mxu0 %v252_v36 }
  0x25   :  { %614 = vmatpush3.msra.mxu0 %v252_v36  ;;  %648 = vmatprep.subr.mxu1 %v352_v52 }
  0x26   :  { %615 = vmatprep.subr.mxu0 %v251_v37  ;;  %649 = vmatpush3.msra.mxu1 %v352_v52 }
  0x27   :  { %616 = vmatpush3.msra.mxu0 %v251_v37  ;;  %650 = vmatprep.subr.mxu1 %v351_v53 }
  0x28   :  { %617 = vmatprep.subr.mxu0 %v250_v38  ;;  %651 = vmatpush3.msra.mxu1 %v351_v53 }
  0x29   :  { %618 = vmatpush3.msra.mxu0 %v250_v38  ;;  %652 = vmatprep.subr.mxu1 %v350_v54 }
  0x2a   :  { %619 = vmatprep.subr.mxu0 %v249_v39  ;;  %653 = vmatpush3.msra.mxu1 %v350_v54 }
  0x2b   :  { %620 = vmatpush3.msra.mxu0 %v249_v39  ;;  %654 = vmatprep.subr.mxu1 %v349_v55 }
  0x2c   :  { %621 = vmatprep.subr.mxu0 %v248_v40  ;;  %655 = vmatpush3.msra.mxu1 %v349_v55 }
  0x2d   :  { %622 = vmatpush3.msra.mxu0 %v248_v40  ;;  %656 = vmatprep.subr.mxu1 %v348_v56 }
  0x2e   :  { %623 = vmatprep.subr.mxu0 %v247_v41  ;;  %657 = vmatpush3.msra.mxu1 %v348_v56 }
  0x2f   :  { %624 = vmatpush3.msra.mxu0 %v247_v41  ;;  %658 = vmatprep.subr.mxu1 %v347_v57 }
  0x30   :  { %625 = vmatprep.subr.mxu0 %v246_v42  ;;  %659 = vmatpush3.msra.mxu1 %v347_v57 }
  0x31   :  { %626 = vmatpush3.msra.mxu0 %v246_v42  ;;  %660 = vmatprep.subr.mxu1 %v346_v58 }
  0x32   :  { %627 = vmatprep.subr.mxu0 %v245_v43  ;;  %661 = vmatpush3.msra.mxu1 %v346_v58 }
  0x33   :  { %628 = vmatpush3.msra.mxu0 %v245_v43  ;;  %662 = vmatprep.subr.mxu1 %v345_v59 }
  0x34   :  { %629 = vmatprep.subr.mxu0 %v244_v44  ;;  %663 = vmatpush3.msra.mxu1 %v345_v59 }
  0x35   :  { %630 = vmatpush3.msra.mxu0 %v244_v44  ;;  %664 = vmatprep.subr.mxu1 %v344_v60 }
  0x36   :  { %631 = vmatprep.subr.mxu0 %v243_v45  ;;  %665 = vmatpush3.msra.mxu1 %v344_v60 }
  0x37   :  { %632 = vmatpush3.msra.mxu0 %v243_v45  ;;  %666 = vmatprep.subr.mxu1 %v343_v61 }
  0x38   :  { %633 = vmatprep.subr.mxu0 %v242_v46  ;;  %667 = vmatpush3.msra.mxu1 %v343_v61 }
  0x39   :  { %634 = vmatpush3.msra.mxu0 %v242_v46  ;;  %668 = vmatprep.subr.mxu1 %v342_v62 }
  0x3a   :  { %635 = vmatprep.subr.mxu0 %v241_v47  ;;  %669 = vmatpush3.msra.mxu1 %v342_v62 }
  0x3b   :  { %636 = vmatpush3.msra.mxu0 %v241_v47  ;;  %670 = vmatprep.subr.mxu1 %v341_v63 }
  0x3c   :  { %637 = vmatprep.subr.mxu0 %v240_v48  ;;  %671 = vmatpush3.msra.mxu1 %v341_v63 }
  0x3d   :  { %638 = vmatpush3.msra.mxu0 %v240_v48  ;;  %672 = vmatprep.subr.mxu1 %v340_v11 }
  0x3e   :  { %639 = vmatprep.subr.mxu0 %v239_v49  ;;  %673 = vmatpush3.msra.mxu1 %v340_v11 }
  0x3f   :  { %640 = vmatpush3.msra.mxu0 %v239_v49  ;;  %674 = vmatprep.subr.mxu1 %v339_v12 }
  0x40   :  { %641 = vmatprep.subr.mxu0 %v238_v50  ;;  %675 = vmatpush3.msra.mxu1 %v339_v12 }
  0x41   :  { %642 = vmatpush3.msra.mxu0 %v238_v50  ;;  %676 = vmatprep.subr.mxu1 %v338_v13 }
  0x42   :  { %643 = vmatprep.subr.mxu0 %v237_v51  ;;  %677 = vmatpush3.msra.mxu1 %v338_v13 }
  0x43   :  { %644 = vmatpush3.msra.mxu0 %v237_v51  ;;  %678 = vmatprep.subr.mxu1 %v337_v14 }
  0x44   :  { %679 = vmatpush3.msra.mxu1 %v337_v14 }
  0xe3   :  { %v577_v0 = vpop.f32.mrf.mxu0 }
  0xe4   :  { %v612_v1 = vpop.f32.mrf.mxu1 }
  0xe5   :  { %v224_v3 = vadd.f32 %v612_v1, %v577_v0  ;;  %v143_v4 = vpop.f32.mrf.mxu0 }
  0xe6   :  { %v218_v5 = vpop.f32.mrf.mxu1 }
  0xe7   :  { %v219_v6 = vadd.f32 %v218_v5, %v143_v4  ;;  %v234_v7 = vadd.f32 %v466_v2, %v224_v3 }
  0xe9   :  { %v233_v8 = vadd.f32 %v466_v2, %v219_v6  ;;  %v236_v10 = vmax.f32 %v234_v7, 0.0 }
  0xeb   :  { %v235_v9 = vmax.f32 %v233_v8, 0.0 }
  0xed   :  { %645 = vmatprep.mubr.f32.mxu0 %v235_v9 }
  0xee   :  { %646 = vmatmul.mubr.f32.vlgmr.msra.gmra.mxu0 %v236_v10 }
 0x1ae   :  { %v647_v16 = vpop.f32.mrf.mxu0 }
 0x1af   :  { %v332_v17 = vadd.f32 %v647_v16, %v467_v15 }
 0x1b0   :  { %v326_v18 = vpop.f32.mrf.mxu0 }
 0x1b1   :  { %v327_v19 = vadd.f32 %v467_v15, %v326_v18  ;;  %v336_v21 = vmax.f32 %v332_v17, 0.0 }
 0x1b3   :  { %v335_v20 = vmax.f32 %v327_v19, 0.0 }
 0x1b5   :  { %680 = vmatprep.mubr.f32.mxu1 %v335_v20 }
 0x1b6   :  { %681 = vmatmul.mubr.f32.vlgmr.msra.gmra.mxu1 %v336_v21 }
 0x276   :  { %v682_v23 = vpop.f32.mrf.mxu1 }
 0x277   :  { %v432_v26 = vadd.f32 %v682_v23, %v468_v24 }
 0x278   :  { %v426_v25 = vpop.f32.mrf.mxu1 }
 0x279   :  { %v427_v27 = vadd.f32 %v468_v24, %v426_v25  ;;  %v436_v30 = vmax.f32 %v432_v26, 0.0 }
 0x27b   :  { %v435_v28 = vmax.f32 %v427_v27, 0.0  ;;  %v446_v32 = vmul.f32 %v469_v29, %v436_v30 }
 0x27d   :  { %v445_v31 = vmul.f32 %v469_v29, %v435_v28 }
 0x27f   :  { %447 = vadd.xlane.f32.xlu0 %v445_v31 }
 0x283   :  { %449 = vadd.xlane.f32.xlu0 %v446_v32 }
 0x308   :  { %v448_v34 = vpop.xlane.xlu0 %447 }
 0x309   :  { %v457_v35 = vadd.f32 %v470_v33, %v448_v34 }
 0x30b   :  { %460 = vst.msk [vmem:[%s979_s11] sm:$0xff] %vm459_vm0, %v457_v35 }
 0x30c   :  { %v450_v36 = vpop.xlane.xlu0 %449 }
 0x30d   :  { %v458_v37 = vadd.f32 %v470_v33, %v450_v36 }
 0x30f   :  { %461 = vst.msk [vmem:[%s979_s11 + $0x8] sm:$0xff] %vm459_vm0, %v458_v37 }

</bundles_post_ra>
